<compile_context>
chip_gen: v7x
topology: tpu7x:2x2x1
jax: 0.10.0
libtpu: 0.0.40
codegen_flags: <defaults>
</compile_context>

<pallas_src>
import math

import jax
import jax.numpy as jnp
from jax.experimental import pallas as pl
from jax.experimental.pallas import tpu as pltpu


def _hbm_copy_kernel(x_hbm, o_hbm, sem):
    """Materializing copy: two in-flight HBM->HBM DMAs, no VMEM staging."""
    n = x_hbm.shape[0]
    if n >= 2:
        # Split the rows in half so two DMAs are in flight at once
        # (per review item #4: "2 in-flight with a DMA semaphore pair").
        h = n // 2
        c0 = pltpu.make_async_copy(x_hbm.at[0:h], o_hbm.at[0:h], sem.at[0])
        c1 = pltpu.make_async_copy(x_hbm.at[h:n], o_hbm.at[h:n], sem.at[1])
        c0.start()
        c1.start()
        c0.wait()
        c1.wait()
    else:
        c0 = pltpu.make_async_copy(x_hbm, o_hbm, sem.at[0])
        c0.start()
        c0.wait()


def flatten(x, *, materialize=True):
    """Pallas equivalent of torch `x.view(x.shape[0], -1)`.

    materialize=False (recommended inside a real model, review item #1):
        return the reshape view directly — no kernel, no extra HBM traffic.
    materialize=True (default; the Pallas deliverable):
        produce a freshly materialized lane-dense (N, C*H*W) array via an
        HBM->HBM DMA copy kernel (review item #4).
    """
    n = x.shape[0]
    flat = math.prod(x.shape[1:]) if x.ndim > 1 else 1

    # The (at most one) physical relayout lives here; XLA bitcasts it away
    # whenever the layouts are already compatible.  See TODO(synk) above.
    x2 = jnp.reshape(x, (n, flat))
    if not materialize:
        return x2

    nbytes = n * flat * jnp.dtype(x.dtype).itemsize
    return pl.pallas_call(
        _hbm_copy_kernel,
        out_shape=jax.ShapeDtypeStruct((n, flat), x.dtype),
        in_specs=[pl.BlockSpec(memory_space=pl.ANY)],
        out_specs=pl.BlockSpec(memory_space=pl.ANY),
        scratch_shapes=[pltpu.SemaphoreType.DMA((2,))],
        cost_estimate=pl.CostEstimate(
            flops=0, transcendentals=0, bytes_accessed=2 * nbytes),
    )(x2)


if __name__ == "__main__":
    key = jax.random.PRNGKey(0)
    k0, k1 = jax.random.split(key)

    # Small NCHW feature map, as produced right before Flatten in the HW5 CNN.
    x = jax.random.normal(k0, (2, 4, 16, 16), dtype=jnp.float32)
    y = flatten(x)  # Pallas DMA-copy kernel path
    jax.block_until_ready(y)
    ref = x.reshape(x.shape[0], -1)
    assert y.shape == (2, 4 * 16 * 16), y.shape
    assert y.dtype == x.dtype
    assert bool(jnp.array_equal(y, ref))

    # Zero-copy view path (review item #1) must agree as well.
    y_view = flatten(x, materialize=False)
    assert y_view.shape == (2, 4 * 16 * 16)
    assert bool(jnp.array_equal(y_view, ref))

    # Larger batch exercises the two-in-flight DMA split.
    x2 = jax.random.normal(k1, (16, 8, 32, 32), dtype=jnp.float32)
    y2 = flatten(x2)
    jax.block_until_ready(y2)
    assert y2.shape == (16, 8 * 32 * 32), y2.shape
    assert bool(jnp.array_equal(y2, x2.reshape(x2.shape[0], -1)))

    print("KERNEL_OK")
</pallas_src>

<mosaic_0001>
module attributes {stable_mosaic.version = 11 : i64} {
  func.func @_hbm_copy_kernel(%arg0: memref<2x1024xf32, #tpu.memory_space<any>>, %arg1: memref<2x1024xf32, #tpu.memory_space<any>>, %arg2: memref<2x!tpu.dma_semaphore, #tpu.memory_space<semaphore_mem>>) attributes {dimension_semantics = [], scalar_prefetch = 0 : i64, scratch_operands = 1 : i64, tpu.core_type = #tpu.core_type<tc>} {
    %c0_i32 = arith.constant 0 : i32
    %c0_i32_0 = arith.constant 0 : i32
    %c0_i32_1 = arith.constant 0 : i32
    %0 = tpu.memref_slice %arg0[%c0_i32_0, %c0_i32_1] : memref<2x1024xf32, #tpu.memory_space<any>> -> memref<1x1024xf32, #tpu.memory_space<any>>
    %c0_i32_2 = arith.constant 0 : i32
    %c0_i32_3 = arith.constant 0 : i32
    %1 = tpu.memref_slice %arg1[%c0_i32_2, %c0_i32_3] : memref<2x1024xf32, #tpu.memory_space<any>> -> memref<1x1024xf32, #tpu.memory_space<any>>
    %2 = tpu.memref_slice %arg2[%c0_i32] : memref<2x!tpu.dma_semaphore, #tpu.memory_space<semaphore_mem>> -> memref<1x!tpu.dma_semaphore, #tpu.memory_space<semaphore_mem>>
    %3 = tpu.memref_squeeze %2 : memref<1x!tpu.dma_semaphore, #tpu.memory_space<semaphore_mem>> -> memref<!tpu.dma_semaphore, #tpu.memory_space<semaphore_mem>>
    tpu.enqueue_dma source(%0 : memref<1x1024xf32, #tpu.memory_space<any>>) target(%1 : memref<1x1024xf32, #tpu.memory_space<any>>) target_semaphore(%3 : memref<!tpu.dma_semaphore, #tpu.memory_space<semaphore_mem>>)
    %c1_i32 = arith.constant 1 : i32
    %c1_i32_4 = arith.constant 1 : i32
    %c0_i32_5 = arith.constant 0 : i32
    %4 = tpu.memref_slice %arg0[%c1_i32_4, %c0_i32_5] : memref<2x1024xf32, #tpu.memory_space<any>> -> memref<1x1024xf32, #tpu.memory_space<any>>
    %c1_i32_6 = arith.constant 1 : i32
    %c0_i32_7 = arith.constant 0 : i32
    %5 = tpu.memref_slice %arg1[%c1_i32_6, %c0_i32_7] : memref<2x1024xf32, #tpu.memory_space<any>> -> memref<1x1024xf32, #tpu.memory_space<any>>
    %6 = tpu.memref_slice %arg2[%c1_i32] : memref<2x!tpu.dma_semaphore, #tpu.memory_space<semaphore_mem>> -> memref<1x!tpu.dma_semaphore, #tpu.memory_space<semaphore_mem>>
    %7 = tpu.memref_squeeze %6 : memref<1x!tpu.dma_semaphore, #tpu.memory_space<semaphore_mem>> -> memref<!tpu.dma_semaphore, #tpu.memory_space<semaphore_mem>>
    tpu.enqueue_dma source(%4 : memref<1x1024xf32, #tpu.memory_space<any>>) target(%5 : memref<1x1024xf32, #tpu.memory_space<any>>) target_semaphore(%7 : memref<!tpu.dma_semaphore, #tpu.memory_space<semaphore_mem>>)
    %c0_i32_8 = arith.constant 0 : i32
    %c0_i32_9 = arith.constant 0 : i32
    %c0_i32_10 = arith.constant 0 : i32
    %8 = tpu.memref_slice %arg0[%c0_i32_9, %c0_i32_10] : memref<2x1024xf32, #tpu.memory_space<any>> -> memref<1x1024xf32, #tpu.memory_space<any>>
    %c0_i32_11 = arith.constant 0 : i32
    %c0_i32_12 = arith.constant 0 : i32
    %9 = tpu.memref_slice %arg1[%c0_i32_11, %c0_i32_12] : memref<2x1024xf32, #tpu.memory_space<any>> -> memref<1x1024xf32, #tpu.memory_space<any>>
    %10 = tpu.memref_slice %arg2[%c0_i32_8] : memref<2x!tpu.dma_semaphore, #tpu.memory_space<semaphore_mem>> -> memref<1x!tpu.dma_semaphore, #tpu.memory_space<semaphore_mem>>
    %11 = tpu.memref_squeeze %10 : memref<1x!tpu.dma_semaphore, #tpu.memory_space<semaphore_mem>> -> memref<!tpu.dma_semaphore, #tpu.memory_space<semaphore_mem>>
    tpu.wait_dma2 semaphore(%11 : memref<!tpu.dma_semaphore, #tpu.memory_space<semaphore_mem>>) src(%8 : memref<1x1024xf32, #tpu.memory_space<any>>) dst(%9 : memref<1x1024xf32, #tpu.memory_space<any>>)
    %c1_i32_13 = arith.constant 1 : i32
    %c1_i32_14 = arith.constant 1 : i32
    %c0_i32_15 = arith.constant 0 : i32
    %12 = tpu.memref_slice %arg0[%c1_i32_14, %c0_i32_15] : memref<2x1024xf32, #tpu.memory_space<any>> -> memref<1x1024xf32, #tpu.memory_space<any>>
    %c1_i32_16 = arith.constant 1 : i32
    %c0_i32_17 = arith.constant 0 : i32
    %13 = tpu.memref_slice %arg1[%c1_i32_16, %c0_i32_17] : memref<2x1024xf32, #tpu.memory_space<any>> -> memref<1x1024xf32, #tpu.memory_space<any>>
    %14 = tpu.memref_slice %arg2[%c1_i32_13] : memref<2x!tpu.dma_semaphore, #tpu.memory_space<semaphore_mem>> -> memref<1x!tpu.dma_semaphore, #tpu.memory_space<semaphore_mem>>
    %15 = tpu.memref_squeeze %14 : memref<1x!tpu.dma_semaphore, #tpu.memory_space<semaphore_mem>> -> memref<!tpu.dma_semaphore, #tpu.memory_space<semaphore_mem>>
    tpu.wait_dma2 semaphore(%15 : memref<!tpu.dma_semaphore, #tpu.memory_space<semaphore_mem>>) src(%12 : memref<1x1024xf32, #tpu.memory_space<any>>) dst(%13 : memref<1x1024xf32, #tpu.memory_space<any>>)
    return
  }
}

</mosaic_0001>

<bundles_post_ra>
// kernel: tpu_custom_call.1
= control target key start
LH: loop header
LB: loop body
LE: loop exit
PB: predicated region body
PF: predicated region fallthrough
CT: control target
= control target key end

     0   :  { %s78_s6 = smov 32   ;;  %s79_s7 = smov 1   ;;  %s107_s0 = inlined_call_operand.hbm [shape: f32[2,1024], index: 0, kind: input, shape index: {}]   ;;  %s108_s1 = inlined_call_operand.hbm [shape: f32[2,1024], index: 1, kind: output, shape index: {}]  }
   0x1   :  { %18 = sst [smem:[#allocation4]] %s78_s6  ;;  %s80_s8 = smov [#allocation2]  }
   0x2   :  { %20 = sst [smem:[#allocation4 + $0x1]] %s78_s6  ;;  %s81_s9 = smov [#allocation3]  }
   0x3   :  { %22 = sst [smem:[#allocation4 + $0x2]] %s79_s7  ;;  %s82_s10 = smov 0  }
   0x4   :  { %24 = dma.general %s107_s0, 128, %s108_s1, %s80_s8, %s81_s9, [#allocation4], %s82_s10, 0  }
   0x5   :  { %40 = sst [smem:[#allocation6]] %s78_s6  ;;  %s25_s17 = scalar_lea.hbm %s107_s0, 16 }
   0x6   :  { %42 = sst [smem:[#allocation6 + $0x1]] %s78_s6  ;;  %s26_s20 = scalar_lea.hbm %s108_s1, 16 }
   0x7   :  { %44 = sst [smem:[#allocation6 + $0x2]] %s79_s7  ;;  %s83_s21 = smov [#allocation2 + $0x1]  }
   0x8   :  { %s84_s22 = smov [#allocation5]  }
   0x9   :  { %46 = dma.general %s25_s17, 128, %s26_s20, %s83_s21, %s84_s22, [#allocation6], %s82_s10, 0  }
   0xa   :  { %74 = dma.done.wait [#allocation2], 128 }
   0xb   :  { %75 = vsyncadd [#allocation2], 4294967168 }
   0xc   :  { %76 = dma.done.wait [#allocation2 + $0x1], 128 }
   0xd   :  { %77 = vsyncadd [#allocation2 + $0x1], 4294967168 }
   0xe   :  { %52 = vsyncmov [#allocation2] }
  0x11   :  { %s53_s23 = vpop.sfrf %52 }
  0x12   :  { %p65_p0 = scmp.ne.s32.totalorder %s53_s23, 0 }
  0x14   :  { %57 = shalt.err (%p65_p0)  }
  0x15   :  { %59 = vsyncmov [#allocation2 + $0x1] }
  0x18   :  { %s60_s24 = vpop.sfrf %59 }
  0x19   :  { %p66_p1 = scmp.ne.s32.totalorder %s60_s24, 0 }
  0x1b   :  { %64 = shalt.err (%p66_p1)  }

</bundles_post_ra>
